<compile_context>
chip_gen: v6e
topology: v6e:2x2x1
jax: 0.10.0
libtpu: 0.0.40
codegen_flags: <defaults>
</compile_context>

<pallas_src>
import math
from dataclasses import dataclass

import jax
import jax.numpy as jnp
from jax.experimental import pallas as pl
from jax.experimental.pallas import tpu as pltpu


# ----------------------------- config ---------------------------------------
@dataclass
class Config:
    hidden_size: int = 32                 # transformer hidden size (hypernet input)
    num_hidden_layers: int = 3
    hypernetwork_bottleneck: int = 16     # SimpleGenerator.hidden_dim
    encoder_adapter_dim: int = 8
    decoder_adapter_dim: int = 8


LAYER_EMBED_DIM = 10   # hard-coded "10" in the PyTorch module
LANE = 128
SUBLANE = 8


def _round_up(x, m):
    return ((x + m - 1) // m) * m


# ----------------------------- Pallas kernel --------------------------------
def _generator_kernel(hin_ref, emb_ref, w1h_ref, w1e_ref, b1_ref, wh_ref, out_ref):
    """Fused hypernetwork forward for all layers in one shot.

    hin : (B_pad, hid)        bf16  zero-padded hidden inputs (rows % 8 == 0)
    emb : (L, 10)             bf16  layer-embedding rows 0..L-1
    w1h : (hid, hdim)         bf16  linear1 weight, hidden-input part
    w1e : (10, hdim)          bf16  linear1 weight, layer-embed part
    b1  : (1, hdim)           f32   linear1 bias
    wh  : (hdim, n_out_pad)   bf16  fused heads, each 128-lane padded
    out : (L*B_pad, n_out_pad) f32
    """
    # linear1: the concat([hidden, emb]) of the PyTorch module is folded into
    # the sum of two small GEMMs (f32 accumulation on the MXU).
    h_base = jnp.dot(hin_ref[...], w1h_ref[...],
                     preferred_element_type=jnp.float32) + b1_ref[...]    # (B_pad, hdim)
    emb_h = jnp.dot(emb_ref[...], w1e_ref[...],
                    preferred_element_type=jnp.float32)                   # (L, hdim)

    wh = wh_ref[...]
    n_layers = emb_ref.shape[0]
    b_pad = hin_ref.shape[0]
    for l in range(n_layers):                      # static trip count, unrolled
        h_l = jnp.maximum(h_base + emb_h[l:l + 1, :], 0.0)                # (B_pad, hdim)
        out_ref[l * b_pad:(l + 1) * b_pad, :] = jnp.dot(
            h_l.astype(wh.dtype), wh, preferred_element_type=jnp.float32)
        # head biases are constant 0 (hyperfanin init) -> no bias add needed.


def fused_generator(hin_pad, emb, w1h, w1e, b1, wh_pad):
    """Run the fused two-GEMM hypernetwork. Returns (L*B_pad, n_out_pad) f32."""
    n_layers = emb.shape[0]
    b_pad = hin_pad.shape[0]
    n_out_pad = wh_pad.shape[1]
    vmem_spec = lambda: pl.BlockSpec(memory_space=pltpu.MemorySpace.VMEM)
    return pl.pallas_call(
        _generator_kernel,
        out_shape=jax.ShapeDtypeStruct((n_layers * b_pad, n_out_pad), jnp.float32),
        # no grid: single invocation, whole (tiny) arrays resident in VMEM,
        # no pointless double-buffering.
        in_specs=[vmem_spec() for _ in range(6)],
        out_specs=vmem_spec(),
    )(hin_pad, emb, w1h, w1e, b1, wh_pad)


# ----------------------------- parameter setup -------------------------------
def init_params(key, config: Config, hidden_size: int, only_using_last_layer: bool):
    """Deterministic init mirroring the PyTorch __init__ shapes.

    Keeps f32 masters (for the reference path) plus the kernel-side tensors:
    bf16 operands, linear1 split into hidden/embed parts, fused lane-padded heads.
    """
    adapter_dim = config.decoder_adapter_dim      # is_encoder=False
    input_dim = config.hidden_size + LAYER_EMBED_DIM
    hdim = config.hypernetwork_bottleneck
    hid = config.hidden_size

    ks = jax.random.split(key, 8)
    n_embed = 1 if only_using_last_layer else config.num_hidden_layers

    # nn.Embedding: N(0, 1)
    layer_embed = jax.random.normal(ks[0], (n_embed, LAYER_EMBED_DIM), jnp.float32)

    # linear1: default nn.Linear init (uniform +-1/sqrt(fan_in)), stored (in, out)
    bound1 = 1.0 / math.sqrt(input_dim)
    w1 = jax.random.uniform(ks[1], (input_dim, hdim), jnp.float32, -bound1, bound1)
    b1 = jax.random.uniform(ks[2], (1, hdim), jnp.float32, -bound1, bound1)

    # hyperfanin inits: weights uniform with given bounds, biases constant 0
    def hfi_weight(k, out_dim, mainnet_in):
        bound = 0.001 * math.sqrt(3.0 / (hdim * mainnet_in))
        return jax.random.uniform(k, (hdim, out_dim), jnp.float32, -bound, bound)

    def hfi_bias(k, out_dim):
        bound = 0.001 * math.sqrt(3.0 / hdim)
        return jax.random.uniform(k, (hdim, out_dim), jnp.float32, -bound, bound)

    w_wu = hfi_weight(ks[3], hidden_size * adapter_dim, adapter_dim)
    w_wd = hfi_weight(ks[4], hidden_size * adapter_dim, hidden_size)
    w_bu = hfi_bias(ks[5], hidden_size)
    w_bd = hfi_bias(ks[6], adapter_dim)

    head_sizes = (hidden_size * adapter_dim, hidden_size * adapter_dim,
                  hidden_size, adapter_dim)
    padded_sizes = tuple(_round_up(s, LANE) for s in head_sizes)
    head_offsets = tuple(int(sum(padded_sizes[:i])) for i in range(4))

    def pad_cols(w, p):
        return jnp.pad(w, ((0, 0), (0, p - w.shape[1])))

    wh_pad = jnp.concatenate(
        [pad_cols(w, p) for w, p in zip((w_wu, w_wd, w_bu, w_bd), padded_sizes)],
        axis=1)                                   # (hdim, n_out_pad), lane-dense heads

    return dict(
        # f32 masters (reference / faithful to the PyTorch module)
        layer_embed=layer_embed, w1=w1, b1=b1,
        w_wu=w_wu, w_wd=w_wd, w_bu=w_bu, w_bd=w_bd,
        # kernel-side operands (bf16 MXU operands, f32 accumulation in-kernel)
        emb_bf16=layer_embed.astype(jnp.bfloat16),
        w1h_bf16=w1[:hid].astype(jnp.bfloat16),
        w1e_bf16=w1[hid:].astype(jnp.bfloat16),
        wh_pad_bf16=wh_pad.astype(jnp.bfloat16),
        head_sizes=head_sizes, head_offsets=head_offsets,
    )


# ----------------------------- forward (ParameterGenerator) ------------------
def parameter_generator_forward(params, config: Config, hidden_inputs,
                                only_using_last_layer: bool = False):
    """hidden_inputs: (B, config.hidden_size) f32 -> list of per-layer tuples."""
    B, hid = hidden_inputs.shape
    n_layers = 1 if only_using_last_layer else config.num_hidden_layers
    b_pad = _round_up(B, SUBLANE)

    # glue: pad rows to a sublane multiple, cast to bf16 at the call boundary
    hin_pad = jnp.pad(hidden_inputs.astype(jnp.bfloat16), ((0, b_pad - B), (0, 0)))
    emb = params["emb_bf16"][:n_layers]

    out_all = fused_generator(hin_pad, emb, params["w1h_bf16"], params["w1e_bf16"],
                              params["b1"], params["wh_pad_bf16"])

    sizes = params["head_sizes"]
    offs = params["head_offsets"]
    layers = []
    for i in range(n_layers):
        o = out_all[i * b_pad:i * b_pad + B]      # drop padded rows
        layers.append(tuple(o[:, off:off + s] for off, s in zip(offs, sizes)))
    return layers


# ----------------------------- reference (pure JAX, f32) ---------------------
def reference_forward(params, config: Config, hidden_inputs,
                      only_using_last_layer: bool = False):
    B = hidden_inputs.shape[0]
    n_layers = 1 if only_using_last_layer else config.num_hidden_layers
    layers = []
    for i in range(n_layers):
        emb = jnp.broadcast_to(params["layer_embed"][i][None, :], (B, LAYER_EMBED_DIM))
        x = jnp.concatenate([hidden_inputs, emb], axis=1)
        h = jnp.maximum(x @ params["w1"] + params["b1"], 0.0)
        layers.append((h @ params["w_wu"], h @ params["w_wd"],
                       h @ params["w_bu"], h @ params["w_bd"]))
    return layers


# ----------------------------- main ------------------------------------------
if __name__ == "__main__":
    config = Config()
    mainnet_hidden_size = 32      # `hidden_size` arg of ParameterGenerator
    only_last = False
    B = 2

    key = jax.random.PRNGKey(0)
    k_params, k_x = jax.random.split(key)
    params = init_params(k_params, config, mainnet_hidden_size, only_last)
    hidden_inputs = jax.random.normal(k_x, (B, config.hidden_size), jnp.float32)

    out = parameter_generator_forward(params, config, hidden_inputs, only_last)
    out = jax.block_until_ready(out)

    ref = reference_forward(params, config, hidden_inputs, only_last)
    # bf16 operands with f32 accumulation -> loosened tolerance vs. the f32 reference
    for got, exp in zip(out, ref):
        for g, e in zip(got, exp):
            assert g.shape == e.shape, (g.shape, e.shape)
            assert jnp.allclose(g, e, atol=1e-4, rtol=2e-2), \
                float(jnp.max(jnp.abs(g - e)))

    print("KERNEL_OK")
</pallas_src>

<mosaic_0001>
module attributes {stable_mosaic.version = 11 : i64} {
  func.func @_generator_kernel(%arg0: memref<8x32xbf16, #tpu.memory_space<vmem>>, %arg1: memref<3x10xbf16, #tpu.memory_space<vmem>>, %arg2: memref<32x16xbf16, #tpu.memory_space<vmem>>, %arg3: memref<10x16xbf16, #tpu.memory_space<vmem>>, %arg4: memref<1x16xf32, #tpu.memory_space<vmem>>, %arg5: memref<16x768xbf16, #tpu.memory_space<vmem>>, %arg6: memref<24x768xf32, #tpu.memory_space<vmem>>) attributes {dimension_semantics = [], scalar_prefetch = 0 : i64, scratch_operands = 0 : i64, tpu.core_type = #tpu.core_type<tc>} {
    %c0 = arith.constant 0 : index
    %c0_0 = arith.constant 0 : index
    %0 = vector.load %arg0[%c0, %c0_0] : memref<8x32xbf16, #tpu.memory_space<vmem>>, vector<8x32xbf16>
    %c0_1 = arith.constant 0 : index
    %c0_2 = arith.constant 0 : index
    %1 = vector.load %arg2[%c0_1, %c0_2] : memref<32x16xbf16, #tpu.memory_space<vmem>>, vector<32x16xbf16>
    %cst = arith.constant dense<0.000000e+00> : vector<8x16xf32>
    %2 = tpu.matmul %0, %1, %cst {dimension_numbers = #tpu.dot_dimension_numbers<[1], [0], [0], [1], [0, 0, 1, 1], [], []>} : vector<8x32xbf16>, vector<32x16xbf16>, vector<8x16xf32> -> vector<8x16xf32>
    %c0_3 = arith.constant 0 : index
    %c0_4 = arith.constant 0 : index
    %3 = vector.load %arg4[%c0_3, %c0_4] : memref<1x16xf32, #tpu.memory_space<vmem>>, vector<1x16xf32>
    %4 = vector.broadcast %3 : vector<1x16xf32> to vector<8x16xf32>
    %5 = arith.addf %2, %4 : vector<8x16xf32>
    %c0_5 = arith.constant 0 : index
    %c0_6 = arith.constant 0 : index
    %6 = vector.load %arg1[%c0_5, %c0_6] : memref<3x10xbf16, #tpu.memory_space<vmem>>, vector<3x10xbf16>
    %c0_7 = arith.constant 0 : index
    %c0_8 = arith.constant 0 : index
    %7 = vector.load %arg3[%c0_7, %c0_8] : memref<10x16xbf16, #tpu.memory_space<vmem>>, vector<10x16xbf16>
    %cst_9 = arith.constant dense<0.000000e+00> : vector<3x16xf32>
    %8 = tpu.matmul %6, %7, %cst_9 {dimension_numbers = #tpu.dot_dimension_numbers<[1], [0], [0], [1], [0, 0, 1, 1], [], []>} : vector<3x10xbf16>, vector<10x16xbf16>, vector<3x16xf32> -> vector<3x16xf32>
    %c0_10 = arith.constant 0 : index
    %c0_11 = arith.constant 0 : index
    %9 = vector.load %arg5[%c0_10, %c0_11] : memref<16x768xbf16, #tpu.memory_space<vmem>>, vector<16x768xbf16>
    %10 = vector.extract_strided_slice %8 {offsets = [0, 0], sizes = [1, 16], strides = [1, 1]} : vector<3x16xf32> to vector<1x16xf32>
    %11 = vector.broadcast %10 : vector<1x16xf32> to vector<8x16xf32>
    %12 = arith.addf %5, %11 : vector<8x16xf32>
    %cst_12 = arith.constant 0.000000e+00 : f32
    %13 = vector.broadcast %cst_12 : f32 to vector<8x16xf32>
    %14 = arith.maximumf %12, %13 : vector<8x16xf32>
    %15 = arith.truncf %14 : vector<8x16xf32> to vector<8x16xbf16>
    %cst_13 = arith.constant dense<0.000000e+00> : vector<8x768xf32>
    %16 = tpu.matmul %15, %9, %cst_13 {dimension_numbers = #tpu.dot_dimension_numbers<[1], [0], [0], [1], [0, 0, 1, 1], [], []>} : vector<8x16xbf16>, vector<16x768xbf16>, vector<8x768xf32> -> vector<8x768xf32>
    %c0_14 = arith.constant 0 : index
    %c0_15 = arith.constant 0 : index
    %17 = vector.load %arg6[%c0_14, %c0_15] : memref<24x768xf32, #tpu.memory_space<vmem>>, vector<8x768xf32>
    tpu.vector_store %arg6[%c0_14, %c0_15], %16 {strides = array<i32>} : memref<24x768xf32, #tpu.memory_space<vmem>>, vector<8x768xf32>,
    %18 = vector.extract_strided_slice %8 {offsets = [1, 0], sizes = [1, 16], strides = [1, 1]} : vector<3x16xf32> to vector<1x16xf32>
    %19 = vector.broadcast %18 : vector<1x16xf32> to vector<8x16xf32>
    %20 = arith.addf %5, %19 : vector<8x16xf32>
    %cst_16 = arith.constant 0.000000e+00 : f32
    %21 = vector.broadcast %cst_16 : f32 to vector<8x16xf32>
    %22 = arith.maximumf %20, %21 : vector<8x16xf32>
    %23 = arith.truncf %22 : vector<8x16xf32> to vector<8x16xbf16>
    %cst_17 = arith.constant dense<0.000000e+00> : vector<8x768xf32>
    %24 = tpu.matmul %23, %9, %cst_17 {dimension_numbers = #tpu.dot_dimension_numbers<[1], [0], [0], [1], [0, 0, 1, 1], [], []>} : vector<8x16xbf16>, vector<16x768xbf16>, vector<8x768xf32> -> vector<8x768xf32>
    %c8 = arith.constant 8 : index
    %c0_18 = arith.constant 0 : index
    %25 = vector.load %arg6[%c8, %c0_18] : memref<24x768xf32, #tpu.memory_space<vmem>>, vector<8x768xf32>
    tpu.vector_store %arg6[%c8, %c0_18], %24 {strides = array<i32>} : memref<24x768xf32, #tpu.memory_space<vmem>>, vector<8x768xf32>,
    %26 = vector.extract_strided_slice %8 {offsets = [2, 0], sizes = [1, 16], strides = [1, 1]} : vector<3x16xf32> to vector<1x16xf32>
    %27 = vector.broadcast %26 : vector<1x16xf32> to vector<8x16xf32>
    %28 = arith.addf %5, %27 : vector<8x16xf32>
    %cst_19 = arith.constant 0.000000e+00 : f32
    %29 = vector.broadcast %cst_19 : f32 to vector<8x16xf32>
    %30 = arith.maximumf %28, %29 : vector<8x16xf32>
    %31 = arith.truncf %30 : vector<8x16xf32> to vector<8x16xbf16>
    %cst_20 = arith.constant dense<0.000000e+00> : vector<8x768xf32>
    %32 = tpu.matmul %31, %9, %cst_20 {dimension_numbers = #tpu.dot_dimension_numbers<[1], [0], [0], [1], [0, 0, 1, 1], [], []>} : vector<8x16xbf16>, vector<16x768xbf16>, vector<8x768xf32> -> vector<8x768xf32>
    %c16 = arith.constant 16 : index
    %c0_21 = arith.constant 0 : index
    %33 = vector.load %arg6[%c16, %c0_21] : memref<24x768xf32, #tpu.memory_space<vmem>>, vector<8x768xf32>
    tpu.vector_store %arg6[%c16, %c0_21], %32 {strides = array<i32>} : memref<24x768xf32, #tpu.memory_space<vmem>>, vector<8x768xf32>,
    return
  }
}

</mosaic_0001>

<bundles_post_ra>
// kernel: tpu_custom_call.1
= control target key start
LH: loop header
LB: loop body
LE: loop exit
PB: predicated region body
PF: predicated region fallthrough
CT: control target
= control target key end

     0   :  { %11 = vsyncpa [#allocation3], 0  ;;  %s816_s0 = inlined_call_operand.vmem [shape: bf16[8,32], index: 0, kind: input, shape index: {}]   ;;  %s817_s1 = inlined_call_operand.vmem [shape: bf16[3,10], index: 1, kind: input, shape index: {}]   ;;  %s818_s2 = inlined_call_operand.vmem [shape: bf16[32,16], index: 2, kind: input, shape index: {}]   ;;  %s819_s3 = inlined_call_operand.vmem [shape: bf16[10,16], index: 3, kind: input, shape index: {}]   ;;  %s820_s4 = inlined_call_operand.vmem [shape: f32[1,16], index: 4, kind: input, shape index: {}]   ;;  %s821_s5 = inlined_call_operand.hbm [shape: bf16[16,768], index: 5, kind: input, shape index: {}]   ;;  %s822_s6 = inlined_call_operand.hbm [shape: f32[24,768], index: 6, kind: output, shape index: {}]  }
   0x1   :  { %12 = vsyncpa [#allocation4], 0  ;;  %s739_s21 = smov [#allocation2]  }
   0x2   :  { %s28_s22 = sshll.u32 %s739_s21, 4  ;;  %s29_s22 = int_to_ptr.vmem [resolvable:$true] %s28_s22 }
   0x3   :  { %s703_s23 = scalar_lea.vmem %s29_s22, 768  ;;  %p708_p1 = scmp.lt.s32.totalorder %s29_s22, %s29_s22 }
   0x4   :  { %p704_p0 = scmp.ne.s32.totalorder %s29_s22, %s703_s23  ;;  %p709_p2 = scmp.lt.s32.totalorder %s703_s23, %s703_s23 }
   0x6   :  { %p710_p3 = por %p709_p2, %p708_p1 }
   0x8   :  { %p711_p4 = pnand %p710_p3, %p704_p0 }
   0xa   :  { %714 = shalt.err (!%p711_p4)
}
   0xb   :  { %s740_s24 = smov 384   ;;  %s741_s25 = smov 24  }
   0xc   :  { %34 = dma.hbm_to_vmem [thread:$0]  %s821_s5, 768, %s29_s22, [#allocation3], %s740_s24, %s740_s24, %s741_s25  }
   0xd   :  { %735 = dma.done.wait [#allocation3], 768  }
   0xe   :  { %736 = vsyncadd [#allocation3], 4294966528  ;;  %v742_v0 = vmov 0.0   ;;  %vm743_vm0 = vmmov 0   ;;  %v683_v1 = vld [vmem:[%s818_s2 + $0x8] sm:$0xff]   ;;  %vm119_vm1 = vcmask 1044480   ;;  %v169_v13 = vlaneseq }
   0xf   :  { %660 = vmatprep.subr.bf16.mxu0 %v742_v0  ;;  %668 = vmatprep.subr.bf16.mxu1 %v742_v0  ;;  %v684_v2 = vld [vmem:[%s819_s3] sm:$0x1f]   ;;  %vm115_vm2 = vcmask 80896   ;;  %vm63_vm3 = vcmask 261120   ;;  %v694_v11 = vld [vmem:[#allocation2 + $0x14] ss:$24 sps:$4 sm:$0xff]  }
  0x10   :  { %670 = vmatprep.mubr.msk.bf16.mxu1 %vm743_vm0, %v742_v0  ;;  %664 = vmatprep.mubr.msk.bf16.mxu0 %vm743_vm0, %v742_v0  ;;  %v685_v3 = vld [vmem:[%s818_s2] sm:$0xff]   ;;  %v121_v4 = vsel %vm119_vm1, %v684_v2, 0  ;;  %v744_v12 = vmov 0   ;;  %v170_v14 = vshrl.u32 %v169_v13, 7  ;;  %v692_v31 = vld [vmem:[#allocation2 + $0x10] ss:$24 sps:$4 sm:$0xff]  }
  0x11   :  { %661 = vmatpush3.bf16.msra.mxu0 %v683_v1  ;;  %v107_v5 = vld [vmem:[%s817_s1] sm:$0x3]  ;;  %669 = vmatpush3.bf16.msra.mxu1 %v121_v4  ;;  %v688_v7 = vld [vmem:[#allocation2 + $0x4] ss:$24 sps:$4 sm:$0xff]   ;;  %vm206_vm4 = vcmask 130048   ;;  %s745_s2 = smov [#allocation5]  }
  0x12   :  { %662 = vmatprep.subr.bf16.mxu0 %v742_v0  ;;  %v39_v6 = vld [vmem:[%s816_s0] sm:$0xf]  ;;  %v691_v8 = vld [vmem:[#allocation2 + $0xc] ss:$24 sps:$4 sm:$0xff]   ;;  %224 = vmatprep.subr.bf16.mxu1 %v688_v7  ;;  %v171_v15 = vsub.s32 0, %v170_v14  ;;  %v341_v19 = vsub.s32 1, %v170_v14 }
  0x13   :  { %v686_v9 = vld [vmem:[#allocation2] ss:$24 sps:$4 sm:$0xff]   ;;  %v480_v35 = vsub.s32 2, %v170_v14  ;;  %s622_s3 = sshll.u32 %s745_s2, 4  ;;  %s623_s3 = int_to_ptr.vmem [resolvable:$true] %s622_s3 }
  0x14   :  { %671 = vmatmul.mubr.msk.bf16.vlgmr.msra.gmra.mxu1 %vm115_vm2, %v107_v5  ;;  %v689_v10 = vld [vmem:[#allocation2 + $0x8] ss:$24 sps:$4 sm:$0xff]   ;;  %p720_p6 = scmp.lt.s32.totalorder %s623_s3, %s623_s3 }
  0x15   :  { %663 = vmatpush3.bf16.msra.mxu0 %v685_v3  ;;  %225 = vmatpush1.bf16.msra.mxu1 %v686_v9  ;;  %v634_v17 = vld [vmem:[%s820_s4] ss:$0 sm:$0xff]  ;;  %s715_s4 = scalar_lea.vmem %s623_s3, 2304 }
  0x16   :  { %265 = vmatprep.subr.bf16.mxu0 %v691_v8  ;;  %242 = vmatprep.mubr.bf16.mxu1 %v744_v12  ;;  %p716_p5 = scmp.ne.s32.totalorder %s623_s3, %s715_s4  ;;  %p721_p7 = scmp.lt.s32.totalorder %s715_s4, %s715_s4 }
  0x17   :  { %306 = vmatprep.subr.bf16.mxu1 %v694_v11 }
  0x18   :  { %665 = vmatmul.mubr.msk.bf16.vlgmr.msra.gmra.mxu0 %vm63_vm3, %v39_v6  ;;  %p722_p8 = por %p721_p7, %p720_p6 }
  0x19   :  { %266 = vmatpush1.bf16.msra.mxu0 %v689_v10  ;;  %283 = vmatprep.mubr.bf16.mxu0 %v744_v12 }
  0x1a   :  { %363 = vmatprep.subr.bf16.mxu0 %v688_v7  ;;  %p723_p9 = pnand %p722_p8, %p716_p5 }
  0xd4   :  { %v157_v16 = vpop.f32.mrf.mxu1 }
  0xd5   :  { %v172_v18 = vrot.slane %v157_v16, %v171_v15  ;;  %v342_v25 = vrot.slane %v157_v16, %v341_v19  ;;  %v481_v37 = vrot.slane %v157_v16, %v480_v35 }
  0xd6   :  { %v672_v20 = vpop.f32.mrf.mxu1 }
  0xd8   :  { %v101_v21 = vpop.f32.mrf.mxu0  ;;  %v160_v23 = vpop.f32.mrf.mxu1 }
  0xd9   :  { %v102_v22 = vadd.f32 %v634_v17, %v101_v21 }
  0xda   :  { %v666_v24 = vpop.f32.mrf.mxu0  ;;  %v673_v27 = vpop.f32.mrf.mxu1 }
  0xdb   :  { %v173_v26 = vadd.f32 %v172_v18, %v102_v22  ;;  %v343_v33 = vadd.f32 %v342_v25, %v102_v22  ;;  %v482_v38 = vadd.f32 %v481_v37, %v102_v22 }
  0xdc   :  { %v104_v28 = vpop.f32.mrf.mxu0 }
  0xdd   :  { %v174_v29 = vmax.f32 %v173_v26, 0.0  ;;  %v344_v34 = vmax.f32 %v343_v33, 0.0  ;;  %v483_v39 = vmax.f32 %v482_v38, 0.0 }
  0xde   :  { %v667_v30 = vpop.f32.mrf.mxu0 }
  0xdf   :  { %v175_v32 = vpack.c.bf16 %v174_v29, %v174_v29  ;;  %v345_v36 = vpack.c.bf16 %v344_v34, %v344_v34  ;;  %v484_v40 = vpack.c.bf16 %v483_v39, %v483_v39 }
  0xe1   :  { %646 = vmatmul.mubr.msk.bf16.vlgmr.msra.gmra.mxu1 %vm206_vm4, %v175_v32  ;;  %647 = vmatmul.mubr.msk.bf16.vlgmr.msra.gmra.mxu0 %vm206_vm4, %v175_v32 }
  0xe2   :  { %307 = vmatpush1.bf16.msra.mxu1 %v692_v31  ;;  %364 = vmatpush1.bf16.msra.mxu0 %v686_v9 }
  0xe3   :  { %324 = vmatprep.mubr.bf16.mxu1 %v744_v12  ;;  %381 = vmatprep.mubr.bf16.mxu0 %v744_v12 }
  0xe4   :  { %404 = vmatprep.subr.bf16.mxu1 %v691_v8  ;;  %445 = vmatprep.subr.bf16.mxu0 %v694_v11 }
  0xe9   :  { %648 = vmatmul.mubr.msk.bf16.vlgmr.msra.gmra.mxu1 %vm206_vm4, %v175_v32  ;;  %649 = vmatmul.mubr.msk.bf16.vlgmr.msra.gmra.mxu0 %vm206_vm4, %v345_v36 }
  0xea   :  { %405 = vmatpush1.bf16.msra.mxu1 %v689_v10  ;;  %446 = vmatpush1.bf16.msra.mxu0 %v692_v31 }
  0xeb   :  { %422 = vmatprep.mubr.bf16.mxu1 %v744_v12  ;;  %463 = vmatprep.mubr.bf16.mxu0 %v744_v12 }
  0xec   :  { %502 = vmatprep.subr.bf16.mxu1 %v688_v7  ;;  %543 = vmatprep.subr.bf16.mxu0 %v691_v8 }
  0xf1   :  { %650 = vmatmul.mubr.msk.bf16.vlgmr.msra.gmra.mxu1 %vm206_vm4, %v345_v36  ;;  %651 = vmatmul.mubr.msk.bf16.vlgmr.msra.gmra.mxu0 %vm206_vm4, %v345_v36 }
  0xf2   :  { %503 = vmatpush1.bf16.msra.mxu1 %v686_v9  ;;  %544 = vmatpush1.bf16.msra.mxu0 %v689_v10 }
  0xf3   :  { %520 = vmatprep.mubr.bf16.mxu1 %v744_v12  ;;  %561 = vmatprep.mubr.bf16.mxu0 %v744_v12 }
  0xf4   :  { %584 = vmatprep.subr.bf16.mxu1 %v694_v11 }
  0xf9   :  { %652 = vmatmul.mubr.msk.bf16.vlgmr.msra.gmra.mxu1 %vm206_vm4, %v484_v40  ;;  %653 = vmatmul.mubr.msk.bf16.vlgmr.msra.gmra.mxu0 %vm206_vm4, %v484_v40 }
  0xfa   :  { %585 = vmatpush1.bf16.msra.mxu1 %v692_v31  ;;  %602 = vmatprep.mubr.bf16.mxu1 %v744_v12 }
 0x101   :  { %654 = vmatmul.mubr.msk.bf16.vlgmr.msra.gmra.mxu1 %vm206_vm4, %v484_v40 }
 0x1a1   :  { %v244_v41 = vpop.f32.mrf.mxu1  ;;  %v285_v42 = vpop.f32.mrf.mxu0 }
 0x1a2   :  { %333 = vst [vmem:[#allocation5] sm:$0xff] %v244_v41  ;;  %335 = vst [vmem:[#allocation5 + $0x10] sm:$0xff] %v285_v42 }
 0x1a3   :  { %v246_v43 = vpop.f32.mrf.mxu1  ;;  %v287_v44 = vpop.f32.mrf.mxu0 }
 0x1a4   :  { %334 = vst [vmem:[#allocation5 + $0x8] sm:$0xff] %v246_v43  ;;  %336 = vst [vmem:[#allocation5 + $0x18] sm:$0xff] %v287_v44 }
 0x1a5   :  { %v248_v45 = vpop.f32.mrf.mxu1  ;;  %v289_v46 = vpop.f32.mrf.mxu0 }
 0x1a7   :  { %v249_v47 = vpop.f32.mrf.mxu1  ;;  %v290_v48 = vpop.f32.mrf.mxu0 }
 0x1a9   :  { %v326_v49 = vpop.f32.mrf.mxu1  ;;  %v383_v50 = vpop.f32.mrf.mxu0 }
 0x1aa   :  { %337 = vst [vmem:[#allocation5 + $0x20] sm:$0xff] %v326_v49  ;;  %472 = vst [vmem:[#allocation5 + $0x30] sm:$0xff] %v383_v50 }
 0x1ab   :  { %v328_v51 = vpop.f32.mrf.mxu1  ;;  %v385_v52 = vpop.f32.mrf.mxu0 }
 0x1ac   :  { %338 = vst [vmem:[#allocation5 + $0x28] sm:$0xff] %v328_v51  ;;  %473 = vst [vmem:[#allocation5 + $0x38] sm:$0xff] %v385_v52 }
 0x1ad   :  { %v330_v53 = vpop.f32.mrf.mxu1  ;;  %v387_v54 = vpop.f32.mrf.mxu0 }
 0x1af   :  { %v331_v55 = vpop.f32.mrf.mxu1  ;;  %v388_v56 = vpop.f32.mrf.mxu0 }
 0x1b1   :  { %v424_v57 = vpop.f32.mrf.mxu1  ;;  %v465_v58 = vpop.f32.mrf.mxu0 }
 0x1b2   :  { %474 = vst [vmem:[#allocation5 + $0x40] sm:$0xff] %v424_v57  ;;  %476 = vst [vmem:[#allocation5 + $0x50] sm:$0xff] %v465_v58 }
 0x1b3   :  { %v426_v59 = vpop.f32.mrf.mxu1  ;;  %v467_v60 = vpop.f32.mrf.mxu0 }
 0x1b4   :  { %475 = vst [vmem:[#allocation5 + $0x48] sm:$0xff] %v426_v59  ;;  %477 = vst [vmem:[#allocation5 + $0x58] sm:$0xff] %v467_v60 }
 0x1b5   :  { %v428_v61 = vpop.f32.mrf.mxu1  ;;  %v469_v62 = vpop.f32.mrf.mxu0 }
 0x1b7   :  { %v429_v63 = vpop.f32.mrf.mxu1  ;;  %v470_v0 = vpop.f32.mrf.mxu0 }
 0x1b9   :  { %v522_v1 = vpop.f32.mrf.mxu1  ;;  %v563_v2 = vpop.f32.mrf.mxu0 }
 0x1ba   :  { %611 = vst [vmem:[#allocation5 + $0x60] sm:$0xff] %v522_v1  ;;  %613 = vst [vmem:[#allocation5 + $0x70] sm:$0xff] %v563_v2 }
 0x1bb   :  { %v524_v3 = vpop.f32.mrf.mxu1  ;;  %v565_v4 = vpop.f32.mrf.mxu0 }
 0x1bc   :  { %612 = vst [vmem:[#allocation5 + $0x68] sm:$0xff] %v524_v3  ;;  %614 = vst [vmem:[#allocation5 + $0x78] sm:$0xff] %v565_v4 }
 0x1bd   :  { %v526_v5 = vpop.f32.mrf.mxu1  ;;  %v567_v6 = vpop.f32.mrf.mxu0 }
 0x1bf   :  { %v527_v7 = vpop.f32.mrf.mxu1  ;;  %v568_v8 = vpop.f32.mrf.mxu0 }
 0x1c1   :  { %v604_v9 = vpop.f32.mrf.mxu1 }
 0x1c2   :  { %615 = vst [vmem:[#allocation5 + $0x80] sm:$0xff] %v604_v9 }
 0x1c3   :  { %v606_v10 = vpop.f32.mrf.mxu1 }
 0x1c4   :  { %616 = vst [vmem:[#allocation5 + $0x88] sm:$0xff] %v606_v10 }
 0x1c5   :  { %v608_v11 = vpop.f32.mrf.mxu1 }
 0x1c6   :  { %726 = shalt.err (!%p723_p9)
}
 0x1c7   :  { %s746_s13 = smov 768   ;;  %s747_s14 = smov 48   ;;  %v609_v12 = vpop.f32.mrf.mxu1 }
 0x1c8   :  { %628 = dma.vmem_to_hbm [thread:$0]  %s623_s3, 2304, %s822_s6, [#allocation4], %s746_s13, %s746_s13, %s747_s14  }
 0x1c9   :  { %737 = dma.done.wait [#allocation4], 2304  }
 0x1ca   :  { %738 = vsyncadd [#allocation4], 4294964992 }
 0x1cb   :  { %632 = vsyncpa [#allocation3], 1 }
 0x1cc   :  { %633 = vsyncpa [#allocation4], 1 }

</bundles_post_ra>
